<compile_context>
chip_gen: v7x
topology: tpu7x:2x2x1
jax: 0.10.0
libtpu: 0.0.40
codegen_flags: <defaults>
</compile_context>

<pallas_src>
import functools

import jax
import jax.numpy as jnp
from jax.experimental import pallas as pl
from jax.experimental.pallas import tpu as pltpu

INPUT_SIZE = 28 * 28
HIDDEN = 100
CLASSES = 10
NUM_HIDDEN_LINEAR = 10                          # Linear(100,100) blocks
NUM_LINEAR = 1 + NUM_HIDDEN_LINEAR + 1          # 12 Linear layers total
LAYER_DIMS = [INPUT_SIZE] + [HIDDEN] * (NUM_HIDDEN_LINEAR + 1) + [CLASSES]
LEAKY_SLOPE = 0.01                              # PyTorch nn.LeakyReLU default

PAD = 128                                       # padded hidden / class width
DEFAULT_TILE_B = 2048                           # batch rows per grid step
MIN_TILE_B = 16                                 # bf16 sublane-packing granule


def _round_up(x, m):
    return ((x + m - 1) // m) * m


def _leaky_relu(h):
    # slope < 1  =>  max(h, slope*h) == LeakyReLU(h)
    return jnp.maximum(h, LEAKY_SLOPE * h)


def mlp_kernel(x_ref, w_in_ref, b_in_ref, w_h_ref, b_h_ref,
               w_out_ref, b_out_ref, out_ref):
    """One batch tile through all 12 padded Linear layers.

    x_ref    : (tb, 784)        f32   (cast to bf16 on the VPU here)
    w_in_ref : (784, 128)       bf16  (cols 100..127 zero)
    b_in_ref : (1, 128)         f32
    w_h_ref  : (10, 128, 128)   bf16  (rows/cols 100..127 zero)
    b_h_ref  : (10, 1, 128)     f32
    w_out_ref: (128, 128)       bf16  (only [:100, :10] nonzero)
    b_out_ref: (1, 128)         f32
    out_ref  : (tb, 128)        f32   (lanes 10..127 are zero; sliced outside)
    """
    h = x_ref[...].astype(jnp.bfloat16)                       # in-kernel cast

    # Linear(784,100)->LeakyReLU (padded to 128 output lanes).
    h = jnp.dot(h, w_in_ref[...], preferred_element_type=jnp.float32)
    h = _leaky_relu(h + b_in_ref[...]).astype(jnp.bfloat16)

    # 10 x [Linear(100,100) -> LeakyReLU], all as exact 128x128 MXU tiles.
    for i in range(NUM_HIDDEN_LINEAR):
        h = jnp.dot(h, w_h_ref[i], preferred_element_type=jnp.float32)
        h = _leaky_relu(h + b_h_ref[i]).astype(jnp.bfloat16)

    # Final Linear(100,10) (padded to 128x128 matmul; store stays lane-dense).
    h = jnp.dot(h, w_out_ref[...], preferred_element_type=jnp.float32)
    out_ref[...] = h + b_out_ref[...]


def pack_params(params):
    """Zero-pad the PyTorch-shaped params to 128 lanes and stack hidden layers.

    params: list of NUM_LINEAR (W:(in,out) f32, b:(1,out) f32) tuples.
    Returns (w_in, b_in, w_h, b_h, w_out, b_out) kernel-ready arrays.
    Do this ONCE per set of weights; the kernel keeps them VMEM-resident.
    """
    (w0, b0), hidden, (wl, bl) = params[0], params[1:-1], params[-1]

    w_in = jnp.zeros((INPUT_SIZE, PAD), jnp.float32).at[:, :HIDDEN].set(w0)
    b_in = jnp.zeros((1, PAD), jnp.float32).at[:, :HIDDEN].set(b0)

    w_h = jnp.zeros((NUM_HIDDEN_LINEAR, PAD, PAD), jnp.float32)
    b_h = jnp.zeros((NUM_HIDDEN_LINEAR, 1, PAD), jnp.float32)
    for i, (w, b) in enumerate(hidden):
        w_h = w_h.at[i, :HIDDEN, :HIDDEN].set(w)
        b_h = b_h.at[i, :, :HIDDEN].set(b)

    w_out = jnp.zeros((PAD, PAD), jnp.float32).at[:HIDDEN, :CLASSES].set(wl)
    b_out = jnp.zeros((1, PAD), jnp.float32).at[:, :CLASSES].set(bl)

    # bf16 weights feed the MXU; biases stay f32 (added to the f32 accumulator).
    return (w_in.astype(jnp.bfloat16), b_in,
            w_h.astype(jnp.bfloat16), b_h,
            w_out.astype(jnp.bfloat16), b_out)


def dense_model_10x100(x_nchw, packed_params, tile_b=DEFAULT_TILE_B):
    """x_nchw: (B,1,28,28) f32; packed_params: output of pack_params()."""
    w_in, b_in, w_h, b_h, w_out, b_out = packed_params

    B = x_nchw.shape[0]
    x = x_nchw.reshape(B, -1)                     # nn.Flatten, stays f32

    # Batch tile: multiple of 16, capped so the grid has >=2 steps whenever the
    # batch allows (keeps both v7x TensorCores busy via the parallel grid axis).
    b_min = _round_up(B, MIN_TILE_B)
    tb = min(tile_b, _round_up(pl.cdiv(b_min, 2), MIN_TILE_B))
    tb = max(tb, MIN_TILE_B)
    b_pad = _round_up(B, tb)
    if b_pad != B:
        x = jnp.pad(x, ((0, b_pad - B), (0, 0)))
    grid = (b_pad // tb,)

    const = lambda i: (0, 0)                      # params: fetched once
    const3 = lambda i: (0, 0, 0)
    in_specs = [
        pl.BlockSpec((tb, INPUT_SIZE), lambda i: (i, 0)),     # x tile
        pl.BlockSpec(w_in.shape, const),
        pl.BlockSpec(b_in.shape, const),
        pl.BlockSpec(w_h.shape, const3),
        pl.BlockSpec(b_h.shape, const3),
        pl.BlockSpec(w_out.shape, const),
        pl.BlockSpec(b_out.shape, const),
    ]
    out_spec = pl.BlockSpec((tb, PAD), lambda i: (i, 0))      # lane-dense store

    # Advisory cost estimate (padded dims), for XLA scheduling around the call.
    per_row_flops = 2 * (INPUT_SIZE * PAD
                         + NUM_HIDDEN_LINEAR * PAD * PAD
                         + PAD * PAD)
    param_bytes = sum(int(p.size) * p.dtype.itemsize for p in packed_params)
    cost = pl.CostEstimate(
        flops=b_pad * per_row_flops,
        transcendentals=0,
        bytes_accessed=b_pad * (INPUT_SIZE * 4 + PAD * 4) + param_bytes,
    )

    out = pl.pallas_call(
        mlp_kernel,
        out_shape=jax.ShapeDtypeStruct((b_pad, PAD), jnp.float32),
        grid=grid,
        in_specs=in_specs,
        out_specs=out_spec,
        compiler_params=pltpu.CompilerParams(
            dimension_semantics=("parallel",),        # batch tiles across TCs
            vmem_limit_bytes=48 * 1024 * 1024,        # tb=2048 needs > scoped default
        ),
        cost_estimate=cost,
    )(x, w_in, b_in, w_h, b_h, w_out, b_out)

    return out[:B, :CLASSES]                          # drop padding rows / lanes


def init_params(key):
    """PyTorch-style uniform init U[-1/sqrt(fan_in), 1/sqrt(fan_in)].

    Weights stored transposed as (in, out) so the hot path is plain h @ W + b.
    """
    params = []
    for i in range(NUM_LINEAR):
        fan_in, fan_out = LAYER_DIMS[i], LAYER_DIMS[i + 1]
        key, kw, kb = jax.random.split(key, 3)
        bound = 1.0 / (fan_in ** 0.5)
        w = jax.random.uniform(kw, (fan_in, fan_out), jnp.float32, -bound, bound)
        b = jax.random.uniform(kb, (1, fan_out), jnp.float32, -bound, bound)
        params.append((w, b))
    return params


def reference_forward(x_nchw, params):
    """Pure-JAX reference mirroring the kernel's bf16/f32 mixed precision."""
    h = x_nchw.reshape(x_nchw.shape[0], -1).astype(jnp.bfloat16)
    for i, (w, b) in enumerate(params):
        h = jnp.dot(h, w.astype(jnp.bfloat16),
                    preferred_element_type=jnp.float32) + b
        if i < NUM_LINEAR - 1:
            h = jnp.where(h > 0, h, LEAKY_SLOPE * h).astype(jnp.bfloat16)
    return h


def reference_forward_f32(x_nchw, params):
    """Full-f32 reference (PyTorch numerics) — informational comparison only."""
    h = x_nchw.reshape(x_nchw.shape[0], -1)
    for i, (w, b) in enumerate(params):
        h = h @ w + b
        if i < NUM_LINEAR - 1:
            h = jnp.where(h > 0, h, LEAKY_SLOPE * h)
    return h


if __name__ == "__main__":
    key = jax.random.PRNGKey(0)
    key, kx = jax.random.split(key)

    batch = 2
    x = jax.random.normal(kx, (batch, 1, 28, 28), jnp.float32)   # NCHW input
    params = init_params(key)
    packed = pack_params(params)                 # pad/stack once on the host

    fwd = jax.jit(functools.partial(dense_model_10x100, tile_b=DEFAULT_TILE_B))
    out = fwd(x, packed)
    out = jax.block_until_ready(out)

    ref = reference_forward(x, params)           # dtype-matched reference
    ref_f32 = reference_forward_f32(x, params)   # pure-f32 (PyTorch) reference

    assert out.shape == (batch, CLASSES), out.shape
    max_err = jnp.max(jnp.abs(out - ref))
    assert jnp.allclose(out, ref, atol=1e-2, rtol=1e-2), \
        f"max abs err vs bf16 reference: {max_err}"
    # bf16 inputs/weights deviate slightly from full-f32 PyTorch numerics;
    # report but do not assert on it.
    print(f"max |kernel - f32 reference| = {jnp.max(jnp.abs(out - ref_f32)):.3e}")

    print("KERNEL_OK")
</pallas_src>

<mosaic_0001>
module attributes {stable_mosaic.version = 11 : i64} {
  func.func @mlp_kernel(%arg0: i32, %arg1: memref<16x784xf32, #tpu.memory_space<vmem>>, %arg2: memref<784x128xbf16, #tpu.memory_space<vmem>>, %arg3: memref<1x128xf32, #tpu.memory_space<vmem>>, %arg4: memref<10x128x128xbf16, #tpu.memory_space<vmem>>, %arg5: memref<10x1x128xf32, #tpu.memory_space<vmem>>, %arg6: memref<128x128xbf16, #tpu.memory_space<vmem>>, %arg7: memref<1x128xf32, #tpu.memory_space<vmem>>, %arg8: memref<16x128xf32, #tpu.memory_space<vmem>>) attributes {dimension_semantics = [#tpu.dimension_semantics<parallel>], iteration_bounds = array<i64: 1>, scalar_prefetch = 0 : i64, scratch_operands = 0 : i64, tpu.core_type = #tpu.core_type<tc>, window_params = [{transform_indices = @transform_0, window_bounds = array<i64: 16, 784>}, {pipeline_mode = #tpu.pipeline_mode<synchronous>, transform_indices = @transform_1, window_bounds = array<i64: 784, 128>}, {pipeline_mode = #tpu.pipeline_mode<synchronous>, transform_indices = @transform_2, window_bounds = array<i64: 1, 128>}, {pipeline_mode = #tpu.pipeline_mode<synchronous>, transform_indices = @transform_3, window_bounds = array<i64: 10, 128, 128>}, {pipeline_mode = #tpu.pipeline_mode<synchronous>, transform_indices = @transform_4, window_bounds = array<i64: 10, 1, 128>}, {pipeline_mode = #tpu.pipeline_mode<synchronous>, transform_indices = @transform_5, window_bounds = array<i64: 128, 128>}, {pipeline_mode = #tpu.pipeline_mode<synchronous>, transform_indices = @transform_6, window_bounds = array<i64: 1, 128>}, {transform_indices = @transform_7, window_bounds = array<i64: 16, 128>}]} {
    %c0 = arith.constant 0 : index
    %c0_0 = arith.constant 0 : index
    %0 = vector.load %arg1[%c0, %c0_0] : memref<16x784xf32, #tpu.memory_space<vmem>>, vector<16x784xf32>
    %1 = arith.truncf %0 : vector<16x784xf32> to vector<16x784xbf16>
    %c0_1 = arith.constant 0 : index
    %c0_2 = arith.constant 0 : index
    %2 = vector.load %arg2[%c0_1, %c0_2] : memref<784x128xbf16, #tpu.memory_space<vmem>>, vector<784x128xbf16>
    %cst = arith.constant dense<0.000000e+00> : vector<16x128xf32>
    %3 = tpu.matmul %1, %2, %cst {dimension_numbers = #tpu.dot_dimension_numbers<[1], [0], [0], [1], [0, 0, 1, 1], [], []>} : vector<16x784xbf16>, vector<784x128xbf16>, vector<16x128xf32> -> vector<16x128xf32>
    %c0_3 = arith.constant 0 : index
    %c0_4 = arith.constant 0 : index
    %4 = vector.load %arg3[%c0_3, %c0_4] : memref<1x128xf32, #tpu.memory_space<vmem>>, vector<1x128xf32>
    %5 = vector.broadcast %4 : vector<1x128xf32> to vector<16x128xf32>
    %6 = arith.addf %3, %5 : vector<16x128xf32>
    %cst_5 = arith.constant 0.00999999977 : f32
    %7 = vector.broadcast %cst_5 : f32 to vector<16x128xf32>
    %8 = arith.mulf %7, %6 : vector<16x128xf32>
    %9 = arith.maximumf %6, %8 : vector<16x128xf32>
    %10 = arith.truncf %9 : vector<16x128xf32> to vector<16x128xbf16>
    %c0_6 = arith.constant 0 : index
    %c0_7 = arith.constant 0 : index
    %c0_8 = arith.constant 0 : index
    %11 = vector.load %arg4[%c0_6, %c0_7, %c0_8] : memref<10x128x128xbf16, #tpu.memory_space<vmem>>, vector<1x128x128xbf16>
    %12 = vector.shape_cast %11 : vector<1x128x128xbf16> to vector<128x128xbf16>
    %cst_9 = arith.constant dense<0.000000e+00> : vector<16x128xf32>
    %13 = tpu.matmul %10, %12, %cst_9 {dimension_numbers = #tpu.dot_dimension_numbers<[1], [0], [0], [1], [0, 0, 1, 1], [], []>} : vector<16x128xbf16>, vector<128x128xbf16>, vector<16x128xf32> -> vector<16x128xf32>
    %c0_10 = arith.constant 0 : index
    %c0_11 = arith.constant 0 : index
    %c0_12 = arith.constant 0 : index
    %14 = vector.load %arg5[%c0_10, %c0_11, %c0_12] : memref<10x1x128xf32, #tpu.memory_space<vmem>>, vector<1x1x128xf32>
    %15 = vector.shape_cast %14 : vector<1x1x128xf32> to vector<1x128xf32>
    %16 = vector.broadcast %15 : vector<1x128xf32> to vector<16x128xf32>
    %17 = arith.addf %13, %16 : vector<16x128xf32>
    %cst_13 = arith.constant 0.00999999977 : f32
    %18 = vector.broadcast %cst_13 : f32 to vector<16x128xf32>
    %19 = arith.mulf %18, %17 : vector<16x128xf32>
    %20 = arith.maximumf %17, %19 : vector<16x128xf32>
    %21 = arith.truncf %20 : vector<16x128xf32> to vector<16x128xbf16>
    %c1 = arith.constant 1 : index
    %c0_14 = arith.constant 0 : index
    %c0_15 = arith.constant 0 : index
    %22 = vector.load %arg4[%c1, %c0_14, %c0_15] : memref<10x128x128xbf16, #tpu.memory_space<vmem>>, vector<1x128x128xbf16>
    %23 = vector.shape_cast %22 : vector<1x128x128xbf16> to vector<128x128xbf16>
    %cst_16 = arith.constant dense<0.000000e+00> : vector<16x128xf32>
    %24 = tpu.matmul %21, %23, %cst_16 {dimension_numbers = #tpu.dot_dimension_numbers<[1], [0], [0], [1], [0, 0, 1, 1], [], []>} : vector<16x128xbf16>, vector<128x128xbf16>, vector<16x128xf32> -> vector<16x128xf32>
    %c1_17 = arith.constant 1 : index
    %c0_18 = arith.constant 0 : index
    %c0_19 = arith.constant 0 : index
    %25 = vector.load %arg5[%c1_17, %c0_18, %c0_19] : memref<10x1x128xf32, #tpu.memory_space<vmem>>, vector<1x1x128xf32>
    %26 = vector.shape_cast %25 : vector<1x1x128xf32> to vector<1x128xf32>
    %27 = vector.broadcast %26 : vector<1x128xf32> to vector<16x128xf32>
    %28 = arith.addf %24, %27 : vector<16x128xf32>
    %cst_20 = arith.constant 0.00999999977 : f32
    %29 = vector.broadcast %cst_20 : f32 to vector<16x128xf32>
    %30 = arith.mulf %29, %28 : vector<16x128xf32>
    %31 = arith.maximumf %28, %30 : vector<16x128xf32>
    %32 = arith.truncf %31 : vector<16x128xf32> to vector<16x128xbf16>
    %c2 = arith.constant 2 : index
    %c0_21 = arith.constant 0 : index
    %c0_22 = arith.constant 0 : index
    %33 = vector.load %arg4[%c2, %c0_21, %c0_22] : memref<10x128x128xbf16, #tpu.memory_space<vmem>>, vector<1x128x128xbf16>
    %34 = vector.shape_cast %33 : vector<1x128x128xbf16> to vector<128x128xbf16>
    %cst_23 = arith.constant dense<0.000000e+00> : vector<16x128xf32>
    %35 = tpu.matmul %32, %34, %cst_23 {dimension_numbers = #tpu.dot_dimension_numbers<[1], [0], [0], [1], [0, 0, 1, 1], [], []>} : vector<16x128xbf16>, vector<128x128xbf16>, vector<16x128xf32> -> vector<16x128xf32>
    %c2_24 = arith.constant 2 : index
    %c0_25 = arith.constant 0 : index
    %c0_26 = arith.constant 0 : index
    %36 = vector.load %arg5[%c2_24, %c0_25, %c0_26] : memref<10x1x128xf32, #tpu.memory_space<vmem>>, vector<1x1x128xf32>
    %37 = vector.shape_cast %36 : vector<1x1x128xf32> to vector<1x128xf32>
    %38 = vector.broadcast %37 : vector<1x128xf32> to vector<16x128xf32>
    %39 = arith.addf %35, %38 : vector<16x128xf32>
    %cst_27 = arith.constant 0.00999999977 : f32
    %40 = vector.broadcast %cst_27 : f32 to vector<16x128xf32>
    %41 = arith.mulf %40, %39 : vector<16x128xf32>
    %42 = arith.maximumf %39, %41 : vector<16x128xf32>
    %43 = arith.truncf %42 : vector<16x128xf32> to vector<16x128xbf16>
    %c3 = arith.constant 3 : index
    %c0_28 = arith.constant 0 : index
    %c0_29 = arith.constant 0 : index
    %44 = vector.load %arg4[%c3, %c0_28, %c0_29] : memref<10x128x128xbf16, #tpu.memory_space<vmem>>, vector<1x128x128xbf16>
    %45 = vector.shape_cast %44 : vector<1x128x128xbf16> to vector<128x128xbf16>
    %cst_30 = arith.constant dense<0.000000e+00> : vector<16x128xf32>
    %46 = tpu.matmul %43, %45, %cst_30 {dimension_numbers = #tpu.dot_dimension_numbers<[1], [0], [0], [1], [0, 0, 1, 1], [], []>} : vector<16x128xbf16>, vector<128x128xbf16>, vector<16x128xf32> -> vector<16x128xf32>
    %c3_31 = arith.constant 3 : index
    %c0_32 = arith.constant 0 : index
    %c0_33 = arith.constant 0 : index
    %47 = vector.load %arg5[%c3_31, %c0_32, %c0_33] : memref<10x1x128xf32, #tpu.memory_space<vmem>>, vector<1x1x128xf32>
    %48 = vector.shape_cast %47 : vector<1x1x128xf32> to vector<1x128xf32>
    %49 = vector.broadcast %48 : vector<1x128xf32> to vector<16x128xf32>
    %50 = arith.addf %46, %49 : vector<16x128xf32>
    %cst_34 = arith.constant 0.00999999977 : f32
    %51 = vector.broadcast %cst_34 : f32 to vector<16x128xf32>
    %52 = arith.mulf %51, %50 : vector<16x128xf32>
    %53 = arith.maximumf %50, %52 : vector<16x128xf32>
    %54 = arith.truncf %53 : vector<16x128xf32> to vector<16x128xbf16>
    %c4 = arith.constant 4 : index
    %c0_35 = arith.constant 0 : index
    %c0_36 = arith.constant 0 : index
    %55 = vector.load %arg4[%c4, %c0_35, %c0_36] : memref<10x128x128xbf16, #tpu.memory_space<vmem>>, vector<1x128x128xbf16>
    %56 = vector.shape_cast %55 : vector<1x128x128xbf16> to vector<128x128xbf16>
    %cst_37 = arith.constant dense<0.000000e+00> : vector<16x128xf32>
    %57 = tpu.matmul %54, %56, %cst_37 {dimension_numbers = #tpu.dot_dimension_numbers<[1], [0], [0], [1], [0, 0, 1, 1], [], []>} : vector<16x128xbf16>, vector<128x128xbf16>, vector<16x128xf32> -> vector<16x128xf32>
    %c4_38 = arith.constant 4 : index
    %c0_39 = arith.constant 0 : index
    %c0_40 = arith.constant 0 : index
    %58 = vector.load %arg5[%c4_38, %c0_39, %c0_40] : memref<10x1x128xf32, #tpu.memory_space<vmem>>, vector<1x1x128xf32>
    %59 = vector.shape_cast %58 : vector<1x1x128xf32> to vector<1x128xf32>
    %60 = vector.broadcast %59 : vector<1x128xf32> to vector<16x128xf32>
    %61 = arith.addf %57, %60 : vector<16x128xf32>
    %cst_41 = arith.constant 0.00999999977 : f32
    %62 = vector.broadcast %cst_41 : f32 to vector<16x128xf32>
    %63 = arith.mulf %62, %61 : vector<16x128xf32>
    %64 = arith.maximumf %61, %63 : vector<16x128xf32>
    %65 = arith.truncf %64 : vector<16x128xf32> to vector<16x128xbf16>
    %c5 = arith.constant 5 : index
    %c0_42 = arith.constant 0 : index
    %c0_43 = arith.constant 0 : index
    %66 = vector.load %arg4[%c5, %c0_42, %c0_43] : memref<10x128x128xbf16, #tpu.memory_space<vmem>>, vector<1x128x128xbf16>
    %67 = vector.shape_cast %66 : vector<1x128x128xbf16> to vector<128x128xbf16>
    %cst_44 = arith.constant dense<0.000000e+00> : vector<16x128xf32>
    %68 = tpu.matmul %65, %67, %cst_44 {dimension_numbers = #tpu.dot_dimension_numbers<[1], [0], [0], [1], [0, 0, 1, 1], [], []>} : vector<16x128xbf16>, vector<128x128xbf16>, vector<16x128xf32> -> vector<16x128xf32>
    %c5_45 = arith.constant 5 : index
    %c0_46 = arith.constant 0 : index
    %c0_47 = arith.constant 0 : index
    %69 = vector.load %arg5[%c5_45, %c0_46, %c0_47] : memref<10x1x128xf32, #tpu.memory_space<vmem>>, vector<1x1x128xf32>
    %70 = vector.shape_cast %69 : vector<1x1x128xf32> to vector<1x128xf32>
    %71 = vector.broadcast %70 : vector<1x128xf32> to vector<16x128xf32>
    %72 = arith.addf %68, %71 : vector<16x128xf32>
    %cst_48 = arith.constant 0.00999999977 : f32
    %73 = vector.broadcast %cst_48 : f32 to vector<16x128xf32>
    %74 = arith.mulf %73, %72 : vector<16x128xf32>
    %75 = arith.maximumf %72, %74 : vector<16x128xf32>
    %76 = arith.truncf %75 : vector<16x128xf32> to vector<16x128xbf16>
    %c6 = arith.constant 6 : index
    %c0_49 = arith.constant 0 : index
    %c0_50 = arith.constant 0 : index
    %77 = vector.load %arg4[%c6, %c0_49, %c0_50] : memref<10x128x128xbf16, #tpu.memory_space<vmem>>, vector<1x128x128xbf16>
    %78 = vector.shape_cast %77 : vector<1x128x128xbf16> to vector<128x128xbf16>
    %cst_51 = arith.constant dense<0.000000e+00> : vector<16x128xf32>
    %79 = tpu.matmul %76, %78, %cst_51 {dimension_numbers = #tpu.dot_dimension_numbers<[1], [0], [0], [1], [0, 0, 1, 1], [], []>} : vector<16x128xbf16>, vector<128x128xbf16>, vector<16x128xf32> -> vector<16x128xf32>
    %c6_52 = arith.constant 6 : index
    %c0_53 = arith.constant 0 : index
    %c0_54 = arith.constant 0 : index
    %80 = vector.load %arg5[%c6_52, %c0_53, %c0_54] : memref<10x1x128xf32, #tpu.memory_space<vmem>>, vector<1x1x128xf32>
    %81 = vector.shape_cast %80 : vector<1x1x128xf32> to vector<1x128xf32>
    %82 = vector.broadcast %81 : vector<1x128xf32> to vector<16x128xf32>
    %83 = arith.addf %79, %82 : vector<16x128xf32>
    %cst_55 = arith.constant 0.00999999977 : f32
    %84 = vector.broadcast %cst_55 : f32 to vector<16x128xf32>
    %85 = arith.mulf %84, %83 : vector<16x128xf32>
    %86 = arith.maximumf %83, %85 : vector<16x128xf32>
    %87 = arith.truncf %86 : vector<16x128xf32> to vector<16x128xbf16>
    %c7 = arith.constant 7 : index
    %c0_56 = arith.constant 0 : index
    %c0_57 = arith.constant 0 : index
    %88 = vector.load %arg4[%c7, %c0_56, %c0_57] : memref<10x128x128xbf16, #tpu.memory_space<vmem>>, vector<1x128x128xbf16>
    %89 = vector.shape_cast %88 : vector<1x128x128xbf16> to vector<128x128xbf16>
    %cst_58 = arith.constant dense<0.000000e+00> : vector<16x128xf32>
    %90 = tpu.matmul %87, %89, %cst_58 {dimension_numbers = #tpu.dot_dimension_numbers<[1], [0], [0], [1], [0, 0, 1, 1], [], []>} : vector<16x128xbf16>, vector<128x128xbf16>, vector<16x128xf32> -> vector<16x128xf32>
    %c7_59 = arith.constant 7 : index
    %c0_60 = arith.constant 0 : index
    %c0_61 = arith.constant 0 : index
    %91 = vector.load %arg5[%c7_59, %c0_60, %c0_61] : memref<10x1x128xf32, #tpu.memory_space<vmem>>, vector<1x1x128xf32>
    %92 = vector.shape_cast %91 : vector<1x1x128xf32> to vector<1x128xf32>
    %93 = vector.broadcast %92 : vector<1x128xf32> to vector<16x128xf32>
    %94 = arith.addf %90, %93 : vector<16x128xf32>
    %cst_62 = arith.constant 0.00999999977 : f32
    %95 = vector.broadcast %cst_62 : f32 to vector<16x128xf32>
    %96 = arith.mulf %95, %94 : vector<16x128xf32>
    %97 = arith.maximumf %94, %96 : vector<16x128xf32>
    %98 = arith.truncf %97 : vector<16x128xf32> to vector<16x128xbf16>
    %c8 = arith.constant 8 : index
    %c0_63 = arith.constant 0 : index
    %c0_64 = arith.constant 0 : index
    %99 = vector.load %arg4[%c8, %c0_63, %c0_64] : memref<10x128x128xbf16, #tpu.memory_space<vmem>>, vector<1x128x128xbf16>
    %100 = vector.shape_cast %99 : vector<1x128x128xbf16> to vector<128x128xbf16>
    %cst_65 = arith.constant dense<0.000000e+00> : vector<16x128xf32>
    %101 = tpu.matmul %98, %100, %cst_65 {dimension_numbers = #tpu.dot_dimension_numbers<[1], [0], [0], [1], [0, 0, 1, 1], [], []>} : vector<16x128xbf16>, vector<128x128xbf16>, vector<16x128xf32> -> vector<16x128xf32>
    %c8_66 = arith.constant 8 : index
    %c0_67 = arith.constant 0 : index
    %c0_68 = arith.constant 0 : index
    %102 = vector.load %arg5[%c8_66, %c0_67, %c0_68] : memref<10x1x128xf32, #tpu.memory_space<vmem>>, vector<1x1x128xf32>
    %103 = vector.shape_cast %102 : vector<1x1x128xf32> to vector<1x128xf32>
    %104 = vector.broadcast %103 : vector<1x128xf32> to vector<16x128xf32>
    %105 = arith.addf %101, %104 : vector<16x128xf32>
    %cst_69 = arith.constant 0.00999999977 : f32
    %106 = vector.broadcast %cst_69 : f32 to vector<16x128xf32>
    %107 = arith.mulf %106, %105 : vector<16x128xf32>
    %108 = arith.maximumf %105, %107 : vector<16x128xf32>
    %109 = arith.truncf %108 : vector<16x128xf32> to vector<16x128xbf16>
    %c9 = arith.constant 9 : index
    %c0_70 = arith.constant 0 : index
    %c0_71 = arith.constant 0 : index
    %110 = vector.load %arg4[%c9, %c0_70, %c0_71] : memref<10x128x128xbf16, #tpu.memory_space<vmem>>, vector<1x128x128xbf16>
    %111 = vector.shape_cast %110 : vector<1x128x128xbf16> to vector<128x128xbf16>
    %cst_72 = arith.constant dense<0.000000e+00> : vector<16x128xf32>
    %112 = tpu.matmul %109, %111, %cst_72 {dimension_numbers = #tpu.dot_dimension_numbers<[1], [0], [0], [1], [0, 0, 1, 1], [], []>} : vector<16x128xbf16>, vector<128x128xbf16>, vector<16x128xf32> -> vector<16x128xf32>
    %c9_73 = arith.constant 9 : index
    %c0_74 = arith.constant 0 : index
    %c0_75 = arith.constant 0 : index
    %113 = vector.load %arg5[%c9_73, %c0_74, %c0_75] : memref<10x1x128xf32, #tpu.memory_space<vmem>>, vector<1x1x128xf32>
    %114 = vector.shape_cast %113 : vector<1x1x128xf32> to vector<1x128xf32>
    %115 = vector.broadcast %114 : vector<1x128xf32> to vector<16x128xf32>
    %116 = arith.addf %112, %115 : vector<16x128xf32>
    %cst_76 = arith.constant 0.00999999977 : f32
    %117 = vector.broadcast %cst_76 : f32 to vector<16x128xf32>
    %118 = arith.mulf %117, %116 : vector<16x128xf32>
    %119 = arith.maximumf %116, %118 : vector<16x128xf32>
    %120 = arith.truncf %119 : vector<16x128xf32> to vector<16x128xbf16>
    %c0_77 = arith.constant 0 : index
    %c0_78 = arith.constant 0 : index
    %121 = vector.load %arg6[%c0_77, %c0_78] : memref<128x128xbf16, #tpu.memory_space<vmem>>, vector<128x128xbf16>
    %cst_79 = arith.constant dense<0.000000e+00> : vector<16x128xf32>
    %122 = tpu.matmul %120, %121, %cst_79 {dimension_numbers = #tpu.dot_dimension_numbers<[1], [0], [0], [1], [0, 0, 1, 1], [], []>} : vector<16x128xbf16>, vector<128x128xbf16>, vector<16x128xf32> -> vector<16x128xf32>
    %c0_80 = arith.constant 0 : index
    %c0_81 = arith.constant 0 : index
    %123 = vector.load %arg7[%c0_80, %c0_81] : memref<1x128xf32, #tpu.memory_space<vmem>>, vector<1x128xf32>
    %124 = vector.broadcast %123 : vector<1x128xf32> to vector<16x128xf32>
    %125 = arith.addf %122, %124 : vector<16x128xf32>
    %c0_82 = arith.constant 0 : index
    %c0_83 = arith.constant 0 : index
    %126 = vector.load %arg8[%c0_82, %c0_83] : memref<16x128xf32, #tpu.memory_space<vmem>>, vector<16x128xf32>
    tpu.vector_store %arg8[%c0_82, %c0_83], %125 {strides = array<i32>} : memref<16x128xf32, #tpu.memory_space<vmem>>, vector<16x128xf32>,
    return
  }
  func.func @transform_0(%arg0: i32) -> (i32, i32) {
    %c0_i32 = arith.constant 0 : i32
    %c0_i32_0 = arith.constant 0 : i32
    return %arg0, %c0_i32 : i32, i32
  }
  func.func @transform_1(%arg0: i32) -> (i32, i32) {
    %c0_i32 = arith.constant 0 : i32
    %c0_i32_0 = arith.constant 0 : i32
    %c0_i32_1 = arith.constant 0 : i32
    return %c0_i32, %c0_i32_0 : i32, i32
  }
  func.func @transform_2(%arg0: i32) -> (i32, i32) {
    %c0_i32 = arith.constant 0 : i32
    %c0_i32_0 = arith.constant 0 : i32
    %c0_i32_1 = arith.constant 0 : i32
    return %c0_i32, %c0_i32_0 : i32, i32
  }
  func.func @transform_3(%arg0: i32) -> (i32, i32, i32) {
    %c0_i32 = arith.constant 0 : i32
    %c0_i32_0 = arith.constant 0 : i32
    %c0_i32_1 = arith.constant 0 : i32
    %c0_i32_2 = arith.constant 0 : i32
    return %c0_i32, %c0_i32_0, %c0_i32_1 : i32, i32, i32
  }
  func.func @transform_4(%arg0: i32) -> (i32, i32, i32) {
    %c0_i32 = arith.constant 0 : i32
    %c0_i32_0 = arith.constant 0 : i32
    %c0_i32_1 = arith.constant 0 : i32
    %c0_i32_2 = arith.constant 0 : i32
    return %c0_i32, %c0_i32_0, %c0_i32_1 : i32, i32, i32
  }
  func.func @transform_5(%arg0: i32) -> (i32, i32) {
    %c0_i32 = arith.constant 0 : i32
    %c0_i32_0 = arith.constant 0 : i32
    %c0_i32_1 = arith.constant 0 : i32
    return %c0_i32, %c0_i32_0 : i32, i32
  }
  func.func @transform_6(%arg0: i32) -> (i32, i32) {
    %c0_i32 = arith.constant 0 : i32
    %c0_i32_0 = arith.constant 0 : i32
    %c0_i32_1 = arith.constant 0 : i32
    return %c0_i32, %c0_i32_0 : i32, i32
  }
  func.func @transform_7(%arg0: i32) -> (i32, i32) {
    %c0_i32 = arith.constant 0 : i32
    %c0_i32_0 = arith.constant 0 : i32
    return %arg0, %c0_i32 : i32, i32
  }
}

</mosaic_0001>

<bundles_post_ra>
// kernel: dense_model_10x100.1
= control target key start
LH: loop header
LB: loop body
LE: loop exit
PB: predicated region body
PF: predicated region fallthrough
CT: control target
= control target key end

     0   :  { %12 = vsyncpa [#allocation3], 0  ;;  %s2990_s0 = inlined_call_operand.vmem [shape: f32[16,784], index: 0, kind: input, shape index: {}]   ;;  %s2991_s1 = inlined_call_operand.hbm [shape: bf16[784,128], index: 1, kind: input, shape index: {}]   ;;  %s2992_s2 = inlined_call_operand.vmem [shape: f32[1,128], index: 2, kind: input, shape index: {}]   ;;  %s2993_s3 = inlined_call_operand.hbm [shape: bf16[10,128,128], index: 3, kind: input, shape index: {}]   ;;  %s2994_s4 = inlined_call_operand.vmem [shape: f32[10,1,128], index: 4, kind: input, shape index: {}]   ;;  %s2995_s5 = inlined_call_operand.vmem [shape: bf16[128,128], index: 5, kind: input, shape index: {}]   ;;  %s2996_s6 = inlined_call_operand.vmem [shape: f32[1,128], index: 6, kind: input, shape index: {}]   ;;  %s2997_s7 = inlined_call_operand.vmem [shape: f32[16,128], index: 7, kind: output, shape index: {}]  }
   0x1   :  { %13 = vsyncpa [#allocation5], 0  ;;  %s2699_s24 = smov [#allocation2]   ;;  %s2651_s28 = scalar_lea.hbm %s2991_s1, 6272 }
   0x2   :  { %s21_s25 = sshll.u32 %s2699_s24, 4  ;;  %p2652_p0 = scmp.ne.s32.totalorder %s2991_s1, %s2651_s28  ;;  %s22_s25 = int_to_ptr.vmem [resolvable:$true] %s21_s25 }
   0x3   :  { %p2655_p1 = scmp.lt.u32.totalorder %s2651_s28, %s2991_s1 }
   0x5   :  { %p2657_p2 = pnand %p2655_p1, %p2652_p0 }
   0x7   :  { %2660 = shalt.err (!%p2657_p2)
}
   0x8   :  { %s2661_s10 = scalar_lea.vmem %s22_s25, 6272  ;;  %p2666_p4 = scmp.lt.s32.totalorder %s22_s25, %s22_s25 }
   0x9   :  { %p2662_p3 = scmp.ne.s32.totalorder %s22_s25, %s2661_s10  ;;  %p2667_p5 = scmp.lt.s32.totalorder %s2661_s10, %s2661_s10 }
   0xb   :  { %p2668_p6 = por %p2667_p5, %p2666_p4 }
   0xd   :  { %p2669_p7 = pnand %p2668_p6, %p2662_p3 }
   0xf   :  { %2672 = shalt.err (!%p2669_p7)
}
  0x10   :  { %s2700_s11 = smov 64   ;;  %s2701_s12 = smov 4  }
  0x11   :  { %27 = dma.hbm_to_vmem [thread:$0]  %s2991_s1, 6272, %s22_s25, [#allocation3], %s2700_s11, %s2700_s11, %s2701_s12  }
  0x12   :  { %s2702_s15 = smov [#allocation4]   ;;  %s2673_s19 = scalar_lea.hbm %s2993_s3, 10240 }
  0x13   :  { %s35_s16 = sshll.u32 %s2702_s15, 4  ;;  %p2674_p8 = scmp.ne.s32.totalorder %s2993_s3, %s2673_s19  ;;  %s36_s16 = int_to_ptr.vmem [resolvable:$true] %s35_s16 }
  0x14   :  { %p2677_p9 = scmp.lt.u32.totalorder %s2673_s19, %s2993_s3 }
  0x16   :  { %p2679_p10 = pnand %p2677_p9, %p2674_p8 }
  0x18   :  { %2682 = shalt.err (!%p2679_p10)
}
  0x19   :  { %s2683_s24 = scalar_lea.vmem %s36_s16, 10240  ;;  %p2688_p12 = scmp.lt.s32.totalorder %s36_s16, %s36_s16 }
  0x1a   :  { %p2684_p11 = scmp.ne.s32.totalorder %s36_s16, %s2683_s24  ;;  %p2689_p13 = scmp.lt.s32.totalorder %s2683_s24, %s2683_s24 }
  0x1c   :  { %p2690_p0 = por %p2689_p13, %p2688_p12 }
  0x1e   :  { %p2691_p1 = pnand %p2690_p0, %p2684_p11 }
  0x20   :  { %2694 = shalt.err (!%p2691_p1)
}
  0x21   :  { %41 = dma.hbm_to_vmem [thread:$0]  %s2993_s3, 10240, %s36_s16, [#allocation5], %s2700_s11, %s2700_s11, %s2701_s12  }
  0x22   :  { %2695 = dma.done.wait [#allocation3], 6272  }
  0x23   :  { %2696 = vsyncadd [#allocation3], 4294961024 }
  0x24   :  { %2697 = dma.done.wait [#allocation5], 10240  }
  0x25   :  { %2698 = vsyncadd [#allocation5], 4294957056  ;;  %v2514_v0 = vld [vmem:[#allocation2 + $0x40] sm:$0xff]   ;;  %v2518_v4 = vld [vmem:[#allocation2 + $0x48] sm:$0xff]   ;;  %v2703_v43 = vmov 0.0   ;;  %vm2704_vm0 = vmmov 0  }
  0x26   :  { %v2515_v1 = vld [vmem:[#allocation2] sm:$0xff]   ;;  %2115 = vmatprep.subr.bf16.mxu0 %v2514_v0  ;;  %v2519_v5 = vld [vmem:[#allocation2 + $0x8] sm:$0xff]   ;;  %v2522_v8 = vld [vmem:[#allocation2 + $0x50] sm:$0xff]   ;;  %vm475_vm1 = vcmask 130048  }
  0x27   :  { %v2516_v2 = vld [vmem:[#allocation2 + $0xc0] sm:$0xff]   ;;  %2116 = vmatpush3.bf16.msra.mxu0 %v2515_v1  ;;  %v2520_v6 = vld [vmem:[#allocation2 + $0xc8] sm:$0xff]   ;;  %v2523_v9 = vld [vmem:[#allocation2 + $0x10] sm:$0xff]  }
  0x28   :  { %v2517_v3 = vld [vmem:[#allocation2 + $0x80] sm:$0xff]   ;;  %2137 = vmatprep.subr.bf16.mxu1 %v2516_v2  ;;  %2117 = vmatprep.subr.bf16.mxu0 %v2518_v4  ;;  %v2521_v7 = vld [vmem:[#allocation2 + $0x88] sm:$0xff]   ;;  %v2524_v10 = vld [vmem:[#allocation2 + $0xd0] sm:$0xff]  }
  0x29   :  { %2138 = vmatpush3.bf16.msra.mxu1 %v2517_v3  ;;  %v2525_v11 = vld [vmem:[#allocation2 + $0x90] sm:$0xff]   ;;  %v2526_v12 = vld [vmem:[#allocation2 + $0x58] sm:$0xff]   ;;  %v2530_v16 = vld [vmem:[#allocation2 + $0x60] sm:$0xff]  }
  0x2a   :  { %2139 = vmatprep.subr.bf16.mxu1 %v2520_v6  ;;  %v2527_v13 = vld [vmem:[#allocation2 + $0x18] sm:$0xff]   ;;  %v2531_v17 = vld [vmem:[#allocation2 + $0x20] sm:$0xff]   ;;  %v2534_v20 = vld [vmem:[#allocation2 + $0x68] sm:$0xff]  }
  0x2b   :  { %2118 = vmatpush3.bf16.msra.mxu0 %v2519_v5  ;;  %v2528_v14 = vld [vmem:[#allocation2 + $0xd8] sm:$0xff]   ;;  %v2532_v18 = vld [vmem:[#allocation2 + $0xe0] sm:$0xff]   ;;  %v2535_v21 = vld [vmem:[#allocation2 + $0x28] sm:$0xff]  }
  0x2c   :  { %2119 = vmatprep.subr.bf16.mxu0 %v2522_v8  ;;  %v2529_v15 = vld [vmem:[#allocation2 + $0x98] sm:$0xff]   ;;  %v2533_v19 = vld [vmem:[#allocation2 + $0xa0] sm:$0xff]   ;;  %v2536_v22 = vld [vmem:[#allocation2 + $0xe8] sm:$0xff]  }
  0x2d   :  { %2140 = vmatpush3.bf16.msra.mxu1 %v2521_v7  ;;  %v2537_v23 = vld [vmem:[#allocation2 + $0xa8] sm:$0xff]   ;;  %v2538_v24 = vld [vmem:[#allocation2 + $0x70] sm:$0xff]   ;;  %v2542_v28 = vld [vmem:[#allocation2 + $0x78] sm:$0xff]  }
  0x2e   :  { %2141 = vmatprep.subr.bf16.mxu1 %v2524_v10  ;;  %v2539_v25 = vld [vmem:[#allocation2 + $0x30] sm:$0xff]   ;;  %v2543_v29 = vld [vmem:[#allocation2 + $0x38] sm:$0xff]   ;;  %v56_v31 = vld [vmem:[%s2990_s0 + $0x8] sm:$0xff] }
  0x2f   :  { %2120 = vmatpush3.bf16.msra.mxu0 %v2523_v9  ;;  %v2540_v26 = vld [vmem:[#allocation2 + $0xf0] sm:$0xff]   ;;  %v2544_v30 = vld [vmem:[#allocation2 + $0xf8] sm:$0xff]   ;;  %v63_v32 = vld [vmem:[%s2990_s0 + $0x40] sm:$0xff] }
  0x30   :  { %2121 = vmatprep.subr.bf16.mxu0 %v2526_v12  ;;  %v2541_v27 = vld [vmem:[#allocation2 + $0xb0] sm:$0xff]   ;;  %v70_v33 = vpack.c.bf16 %v63_v32, %v56_v31  ;;  %v2545_v34 = vld [vmem:[#allocation2 + $0xb8] sm:$0xff]   ;;  %v55_v35 = vld [vmem:[%s2990_s0] sm:$0xff] }
  0x31   :  { %2142 = vmatpush3.bf16.msra.mxu1 %v2525_v11  ;;  %v62_v36 = vld [vmem:[%s2990_s0 + $0x38] sm:$0xff]  ;;  %v2546_v38 = vld [vmem:[#allocation2 + $0x140] sm:$0xff]   ;;  %v65_v40 = vld [vmem:[%s2990_s0 + $0x50] sm:$0xff] }
  0x32   :  { %2143 = vmatprep.subr.bf16.mxu1 %v2528_v14  ;;  %511 = vmatprep.mubr.bf16.mxu0 %v70_v33  ;;  %v69_v37 = vpack.c.bf16 %v62_v36, %v55_v35  ;;  %v58_v39 = vld [vmem:[%s2990_s0 + $0x18] sm:$0xff]  ;;  %v2547_v42 = vld [vmem:[#allocation2 + $0x100] sm:$0xff]   ;;  %v57_v44 = vld [vmem:[%s2990_s0 + $0x10] sm:$0xff] }
  0x33   :  { %2122 = vmatpush3.bf16.msra.mxu0 %v2527_v13  ;;  %v72_v41 = vpack.c.bf16 %v65_v40, %v58_v39  ;;  %v64_v45 = vld [vmem:[%s2990_s0 + $0x48] sm:$0xff]  ;;  %v2550_v49 = vld [vmem:[#allocation2 + $0x150] sm:$0xff]   ;;  %v2552_v51 = vld [vmem:[#allocation2 + $0x158] sm:$0xff]  }
  0x34   :  { %2123 = vmatprep.subr.bf16.mxu0 %v2530_v16  ;;  %v71_v46 = vpack.c.bf16 %v64_v45, %v57_v44  ;;  %v2548_v47 = vld [vmem:[#allocation2 + $0x148] sm:$0xff]   ;;  %v2551_v50 = vld [vmem:[#allocation2 + $0x110] sm:$0xff]   ;;  %v2553_v52 = vld [vmem:[#allocation2 + $0x118] sm:$0xff]  }
  0x35   :  { %2144 = vmatpush3.bf16.msra.mxu1 %v2529_v15  ;;  %552 = vmatprep.mubr.bf16.mxu1 %v72_v41  ;;  %v2549_v48 = vld [vmem:[#allocation2 + $0x108] sm:$0xff]   ;;  %v2554_v53 = vld [vmem:[#allocation2 + $0x160] sm:$0xff]   ;;  %v2558_v59 = vld [vmem:[#allocation2 + $0x170] sm:$0xff]  }
  0x36   :  { %2145 = vmatprep.subr.bf16.mxu1 %v2532_v18  ;;  %v2555_v54 = vld [vmem:[#allocation2 + $0x120] sm:$0xff]   ;;  %v2556_v55 = vld [vmem:[#allocation2 + $0x168] sm:$0xff]   ;;  %v61_v62 = vld [vmem:[%s2990_s0 + $0x30] sm:$0xff] }
  0x37   :  { %2124 = vmatpush3.bf16.msra.mxu0 %v2531_v17  ;;  %v2562_v56 = vld [vmem:[#allocation2 + $0x180] sm:$0xff]   ;;  %v60_v57 = vld [vmem:[%s2990_s0 + $0x28] sm:$0xff]  ;;  %v2559_v1 = vld [vmem:[#allocation2 + $0x130] sm:$0xff]  }
  0x38   :  { %2125 = vmatprep.subr.bf16.mxu0 %v2534_v20  ;;  %v2557_v58 = vld [vmem:[#allocation2 + $0x128] sm:$0xff]   ;;  %v67_v60 = vld [vmem:[%s2990_s0 + $0x60] sm:$0xff]  ;;  %v2560_v2 = vld [vmem:[#allocation2 + $0x178] sm:$0xff]  }
  0x39   :  { %2146 = vmatpush3.bf16.msra.mxu1 %v2533_v19  ;;  %v74_v61 = vpack.c.bf16 %v67_v60, %v60_v57  ;;  %v68_v63 = vld [vmem:[%s2990_s0 + $0x68] sm:$0xff]  ;;  %v2561_v3 = vld [vmem:[#allocation2 + $0x138] sm:$0xff]   ;;  %v59_v4 = vld [vmem:[%s2990_s0 + $0x20] sm:$0xff] }
  0x3a   :  { %2147 = vmatprep.subr.bf16.mxu1 %v2536_v22  ;;  %v75_v0 = vpack.c.bf16 %v68_v63, %v61_v62  ;;  %v66_v5 = vld [vmem:[%s2990_s0 + $0x58] sm:$0xff]  ;;  %v2563_v7 = vld [vmem:[#allocation4] sm:$0xff]   ;;  %v2564_v8 = vld [vmem:[#allocation4 + $0x8] sm:$0xff]  }
  0x3b   :  { %2126 = vmatpush3.bf16.msra.mxu0 %v2535_v21  ;;  %v73_v6 = vpack.c.bf16 %v66_v5, %v59_v4  ;;  %v2565_v9 = vld [vmem:[#allocation4 + $0x10] sm:$0xff]   ;;  %v2566_v10 = vld [vmem:[#allocation4 + $0x18] sm:$0xff]   ;;  %v2567_v11 = vld [vmem:[#allocation4 + $0x20] sm:$0xff]  }
  0x3c   :  { %2127 = vmatprep.subr.bf16.mxu0 %v2538_v24  ;;  %v2568_v12 = vld [vmem:[#allocation4 + $0x28] sm:$0xff]   ;;  %v2569_v13 = vld [vmem:[#allocation4 + $0x30] sm:$0xff]   ;;  %v2570_v14 = vld [vmem:[#allocation4 + $0x38] sm:$0xff]  }
  0x3d   :  { %2148 = vmatpush3.bf16.msra.mxu1 %v2537_v23  ;;  %v2571_v15 = vld [vmem:[#allocation4 + $0x40] sm:$0xff]   ;;  %v2572_v16 = vld [vmem:[#allocation4 + $0x48] sm:$0xff]   ;;  %v2573_v17 = vld [vmem:[#allocation4 + $0x50] sm:$0xff]  }
  0x3e   :  { %2149 = vmatprep.subr.bf16.mxu1 %v2540_v26  ;;  %v2574_v18 = vld [vmem:[#allocation4 + $0x58] sm:$0xff]   ;;  %v2575_v19 = vld [vmem:[#allocation4 + $0x60] sm:$0xff]   ;;  %v2576_v57 = vld [vmem:[#allocation4 + $0x68] sm:$0xff]  }
  0x3f   :  { %2128 = vmatpush3.bf16.msra.mxu0 %v2539_v25  ;;  %v1956_v21 = vld [vmem:[%s2992_s2] ss:$0 sm:$0xff]  ;;  %v2579_v60 = vld [vmem:[#allocation4 + $0x80] sm:$0xff]   ;;  %v2581_v62 = vld [vmem:[#allocation4 + $0x90] sm:$0xff]  }
  0x40   :  { %2129 = vmatprep.subr.bf16.mxu0 %v2542_v28  ;;  %v2582_v63 = vld [vmem:[#allocation4 + $0x98] sm:$0xff]  }
  0x41   :  { %2150 = vmatpush3.bf16.msra.mxu1 %v2541_v27 }
  0x42   :  { %2151 = vmatprep.subr.bf16.mxu1 %v2544_v30 }
  0x43   :  { %2130 = vmatpush3.bf16.msra.mxu0 %v2543_v29 }
  0x44   :  { %2159 = vmatprep.subr.bf16.mxu0 %v2546_v38 }
  0x45   :  { %2152 = vmatpush3.bf16.msra.mxu1 %v2545_v34 }
  0x46   :  { %2282 = vmatprep.subr.bf16.mxu1 %v2703_v43  ;;  %512 = vmatmul.mubr.bf16.vlgmr.msra.gmra.mrb[0].mxu0 %v69_v37 }
  0x47   :  { %2160 = vmatpush3.bf16.msra.mxu0 %v2547_v42  ;;  %593 = vmatprep.mubr.bf16.mxu0 %v74_v61  ;;  %v2580_v61 = vld [vmem:[#allocation4 + $0x88] sm:$0xff]  }
  0x48   :  { %553 = vmatmul.mubr.bf16.vlgmr.msra.gmra.mrb[0].mxu1 %v71_v46  ;;  %2161 = vmatprep.subr.bf16.mxu0 %v2548_v47 }
  0x49   :  { %2284 = vmatprep.mubr.msk.bf16.mxu1 %vm2704_vm0, %v2703_v43  ;;  %2283 = vmatpush3.bf16.msra.mxu1 %v2562_v56 }
  0x4a   :  { %2288 = vmatprep.subr.bf16.mxu1 %v2703_v43 }
  0x4b   :  { %2162 = vmatpush3.bf16.msra.mxu0 %v2549_v48 }
  0x4c   :  { %2163 = vmatprep.subr.bf16.mxu0 %v2550_v49 }
  0x4f   :  { %2164 = vmatpush3.bf16.msra.mxu0 %v2551_v50 }
  0x50   :  { %2165 = vmatprep.subr.bf16.mxu0 %v2552_v51  ;;  %2285 = vmatmul.mubr.msk.bf16.vlgmr.msra.gmra.mrb[4].mxu1 %vm475_vm1, %v75_v0  ;;  %v2583_v0 = vld [vmem:[#allocation4 + $0xa0] sm:$0xff]  }
  0x51   :  { %2304 = vmatprep.mubr.msk.bf16.mxu1 %vm2704_vm0, %v2703_v43  ;;  %2289 = vmatpush3.bf16.msra.mxu1 %v2563_v7 }
  0x52   :  { %2290 = vmatprep.subr.bf16.mxu1 %v2703_v43 }
  0x53   :  { %2166 = vmatpush3.bf16.msra.mxu0 %v2553_v52 }
  0x54   :  { %2167 = vmatprep.subr.bf16.mxu0 %v2554_v53 }
  0x55   :  { %2291 = vmatpush3.bf16.msra.mxu1 %v2564_v8 }
  0x56   :  { %2292 = vmatprep.subr.bf16.mxu1 %v2703_v43 }
  0x57   :  { %2168 = vmatpush3.bf16.msra.mxu0 %v2555_v54 }
  0x58   :  { %2169 = vmatprep.subr.bf16.mxu0 %v2556_v55 }
  0x59   :  { %2293 = vmatpush3.bf16.msra.mxu1 %v2565_v9 }
  0x5a   :  { %2294 = vmatprep.subr.bf16.mxu1 %v2703_v43 }
  0x5b   :  { %2170 = vmatpush3.bf16.msra.mxu0 %v2557_v58  ;;  %v2577_v58 = vld [vmem:[#allocation4 + $0x70] sm:$0xff]  }
  0x5c   :  { %2171 = vmatprep.subr.bf16.mxu0 %v2558_v59  ;;  %v2578_v59 = vld [vmem:[#allocation4 + $0x78] sm:$0xff]  }
  0x5d   :  { %2295 = vmatpush3.bf16.msra.mxu1 %v2566_v10 }
  0x5e   :  { %2296 = vmatprep.subr.bf16.mxu1 %v2703_v43 }
  0x5f   :  { %2172 = vmatpush3.bf16.msra.mxu0 %v2559_v1  ;;  %v2007_v1 = vld [vmem:[%s2994_s4] ss:$0 sm:$0xff] }
  0x60   :  { %2173 = vmatprep.subr.bf16.mxu0 %v2560_v2 }
  0x61   :  { %2297 = vmatpush3.bf16.msra.mxu1 %v2567_v11 }
  0x62   :  { %2298 = vmatprep.subr.bf16.mxu1 %v2703_v43 }
  0x63   :  { %2174 = vmatpush3.bf16.msra.mxu0 %v2561_v3 }
  0x64   :  { %2308 = vmatprep.subr.bf16.mxu0 %v2703_v43 }
  0x65   :  { %2299 = vmatpush3.bf16.msra.mxu1 %v2568_v12 }
  0x66   :  { %594 = vmatmul.mubr.bf16.vlgmr.msra.gmra.mrb[4].mxu0 %v73_v6  ;;  %2300 = vmatprep.subr.bf16.mxu1 %v2703_v43 }
  0x67   :  { %2324 = vmatprep.mubr.msk.bf16.mxu0 %vm2704_vm0, %v2703_v43  ;;  %2309 = vmatpush3.bf16.msra.mxu0 %v2571_v15  ;;  %v2586_v15 = vld [vmem:[#allocation4 + $0xb8] sm:$0xff]  }
  0x68   :  { %2310 = vmatprep.subr.bf16.mxu0 %v2703_v43 }
  0x69   :  { %2301 = vmatpush3.bf16.msra.mxu1 %v2569_v13  ;;  %v2584_v13 = vld [vmem:[#allocation4 + $0xa8] sm:$0xff]  }
  0x6a   :  { %2302 = vmatprep.subr.bf16.mxu1 %v2703_v43 }
  0x6b   :  { %2311 = vmatpush3.bf16.msra.mxu0 %v2572_v16  ;;  %v2587_v16 = vld [vmem:[#allocation4 + $0xc0] sm:$0xff]  }
  0x6c   :  { %2312 = vmatprep.subr.bf16.mxu0 %v2703_v43 }
  0x6d   :  { %2303 = vmatpush3.bf16.msra.mxu1 %v2570_v14  ;;  %v2585_v14 = vld [vmem:[#allocation4 + $0xb0] sm:$0xff]  }
  0x6e   :  { %2328 = vmatprep.subr.bf16.mxu1 %v2703_v43 }
  0x6f   :  { %2313 = vmatpush3.bf16.msra.mxu0 %v2573_v17  ;;  %v2588_v17 = vld [vmem:[#allocation4 + $0xc8] sm:$0xff]  }
  0x70   :  { %2314 = vmatprep.subr.bf16.mxu0 %v2703_v43 }
  0x73   :  { %2315 = vmatpush3.bf16.msra.mxu0 %v2574_v18  ;;  %v2589_v18 = vld [vmem:[#allocation4 + $0xd0] sm:$0xff]  }
  0x74   :  { %2316 = vmatprep.subr.bf16.mxu0 %v2703_v43 }
  0x77   :  { %2317 = vmatpush3.bf16.msra.mxu0 %v2575_v19  ;;  %v2590_v19 = vld [vmem:[#allocation4 + $0xd8] sm:$0xff]  }
  0x78   :  { %2318 = vmatprep.subr.bf16.mxu0 %v2703_v43 }
  0x7b   :  { %2319 = vmatpush3.bf16.msra.mxu0 %v2576_v57  ;;  %v2603_v57 = vld [vmem:[#allocation4 + $0x140] sm:$0xff]  }
  0x7c   :  { %2320 = vmatprep.subr.bf16.mxu0 %v2703_v43 }
  0x7f   :  { %2321 = vmatpush3.bf16.msra.mxu0 %v2577_v58  ;;  %v2604_v58 = vld [vmem:[#allocation4 + $0x148] sm:$0xff]  }
  0x80   :  { %2322 = vmatprep.subr.bf16.mxu0 %v2703_v43 }
  0x83   :  { %2323 = vmatpush3.bf16.msra.mxu0 %v2578_v59  ;;  %v2605_v59 = vld [vmem:[#allocation4 + $0x150] sm:$0xff]  }
  0x84   :  { %2348 = vmatprep.subr.bf16.mxu0 %v2703_v43 }
 0x119   :  { %v2131_v20 = vpop.f32.mrb[0].mxu0 }
 0x11a   :  { %v2132_v22 = vpop.f32.mrb[1].mxu0 }
 0x11b   :  { %v2133_v23 = vadd.f32 %v2132_v22, %v2131_v20  ;;  %v2134_v24 = vpop.f32.mrb[2].mxu0  ;;  %v2153_v25 = vpop.f32.mrb[0].mxu1  ;;  %v2591_v20 = vld [vmem:[#allocation4 + $0xe0] sm:$0xff]  }
 0x11c   :  { %v2135_v26 = vpop.f32.mrb[3].mxu0  ;;  %v2154_v29 = vpop.f32.mrb[1].mxu1 }
 0x11d   :  { %v514_v27 = vadd.f32 %v2133_v23, %v1956_v21  ;;  %v2136_v28 = vadd.f32 %v2135_v26, %v2134_v24  ;;  %v2155_v30 = vadd.f32 %v2154_v29, %v2153_v25  ;;  %v2156_v31 = vpop.f32.mrb[2].mxu1 }
 0x11e   :  { %v2157_v33 = vpop.f32.mrb[3].mxu1 }
 0x11f   :  { %v517_v32 = vadd.f32 %v2136_v28, %v1956_v21  ;;  %v555_v34 = vadd.f32 %v2155_v30, %v514_v27  ;;  %v2158_v35 = vadd.f32 %v2157_v33, %v2156_v31  ;;  %v2017_v21 = vld [vmem:[%s2994_s4 + $0x1] ss:$0 sm:$0xff]  ;;  %v2592_v33 = vld [vmem:[#allocation4 + $0xe8] sm:$0xff]  }
 0x121   :  { %v558_v36 = vadd.f32 %v2158_v35, %v517_v32  ;;  %v2594_v35 = vld [vmem:[#allocation4 + $0xf8] sm:$0xff]  }
 0x123   :  { %v636_v37 = vpop.f32.mrb[4].mxu1 }
 0x124   :  { %v2286_v38 = vpop.f32.mrb[5].mxu1 }
 0x125   :  { %v639_v39 = vpop.f32.mrb[6].mxu1  ;;  %v2597_v38 = vld [vmem:[#allocation4 + $0x110] sm:$0xff]  }
 0x126   :  { %v2287_v40 = vpop.f32.mrb[7].mxu1 }
 0x127   :  { %v2599_v40 = vld [vmem:[#allocation4 + $0x120] sm:$0xff]  }
 0x139   :  { %v2175_v41 = vpop.f32.mrb[4].mxu0 }
 0x13a   :  { %v2176_v42 = vpop.f32.mrb[5].mxu0 }
 0x13b   :  { %v2177_v44 = vadd.f32 %v2176_v42, %v2175_v41  ;;  %v2178_v45 = vpop.f32.mrb[6].mxu0  ;;  %v2027_v41 = vld [vmem:[%s2994_s4 + $0x2] ss:$0 sm:$0xff] }
 0x13c   :  { %v2179_v46 = vpop.f32.mrb[7].mxu0 }
 0x13d   :  { %v596_v47 = vadd.f32 %v2177_v44, %v555_v34  ;;  %v2180_v48 = vadd.f32 %v2179_v46, %v2178_v45  ;;  %v2593_v34 = vld [vmem:[#allocation4 + $0xf0] sm:$0xff]  }
 0x13f   :  { %v637_v49 = vadd.f32 %v636_v37, %v596_v47  ;;  %v599_v50 = vadd.f32 %v2180_v48, %v558_v36  ;;  %v2595_v36 = vld [vmem:[#allocation4 + $0x100] sm:$0xff]   ;;  %v2596_v37 = vld [vmem:[#allocation4 + $0x108] sm:$0xff]  }
 0x141   :  { %v643_v51 = vmul.f32 0.01, %v637_v49  ;;  %v640_v52 = vadd.f32 %v639_v39, %v599_v50  ;;  %v2598_v39 = vld [vmem:[#allocation4 + $0x118] sm:$0xff]  }
 0x143   :  { %v644_v53 = vmul.f32 0.01, %v640_v52  ;;  %v645_v54 = vmax.f32 %v637_v49, %v643_v51 }
 0x145   :  { %v646_v55 = vmax.f32 %v640_v52, %v644_v53 }
 0x147   :  { %v647_v56 = vpack.c.bf16 %v646_v55, %v645_v54  ;;  %v2600_v54 = vld [vmem:[#allocation4 + $0x128] sm:$0xff]   ;;  %v2601_v55 = vld [vmem:[#allocation4 + $0x130] sm:$0xff]  }
 0x149   :  { %2305 = vmatmul.mubr.bf16.vlgmr.msra.gmra.mrb[8].mxu1 %v647_v56  ;;  %v2602_v56 = vld [vmem:[#allocation4 + $0x138] sm:$0xff]  }
 0x14a   :  { %2344 = vmatprep.mubr.msk.bf16.mxu1 %vm2704_vm0, %v2703_v43  ;;  %2329 = vmatpush3.bf16.msra.mxu1 %v2579_v60  ;;  %v2606_v60 = vld [vmem:[#allocation4 + $0x158] sm:$0xff]  }
 0x14b   :  { %2330 = vmatprep.subr.bf16.mxu1 %v2703_v43 }
 0x14e   :  { %2331 = vmatpush3.bf16.msra.mxu1 %v2580_v61  ;;  %v2607_v61 = vld [vmem:[#allocation4 + $0x160] sm:$0xff]  }
 0x14f   :  { %2332 = vmatprep.subr.bf16.mxu1 %v2703_v43 }
 0x152   :  { %2333 = vmatpush3.bf16.msra.mxu1 %v2581_v62  ;;  %v2037_v62 = vld [vmem:[%s2994_s4 + $0x3] ss:$0 sm:$0xff] }
 0x153   :  { %2334 = vmatprep.subr.bf16.mxu1 %v2703_v43 }
 0x156   :  { %2335 = vmatpush3.bf16.msra.mxu1 %v2582_v63 }
 0x157   :  { %2336 = vmatprep.subr.bf16.mxu1 %v2703_v43 }
 0x15a   :  { %2337 = vmatpush3.bf16.msra.mxu1 %v2583_v0 }
 0x15b   :  { %2338 = vmatprep.subr.bf16.mxu1 %v2703_v43 }
 0x15e   :  { %2339 = vmatpush3.bf16.msra.mxu1 %v2584_v13  ;;  %v2611_v13 = vld [vmem:[#allocation4 + $0x180] sm:$0xff]  }
 0x15f   :  { %2340 = vmatprep.subr.bf16.mxu1 %v2703_v43 }
 0x162   :  { %2341 = vmatpush3.bf16.msra.mxu1 %v2585_v14  ;;  %v2612_v14 = vld [vmem:[#allocation4 + $0x188] sm:$0xff]  }
 0x163   :  { %2342 = vmatprep.subr.bf16.mxu1 %v2703_v43 }
 0x166   :  { %2343 = vmatpush3.bf16.msra.mxu1 %v2586_v15  ;;  %v2613_v15 = vld [vmem:[#allocation4 + $0x190] sm:$0xff]  }
 0x167   :  { %2368 = vmatprep.subr.bf16.mxu1 %v2703_v43 }
 0x21c   :  { %v753_v2 = vpop.f32.mrb[8].mxu1 }
 0x21d   :  { %v754_v3 = vadd.f32 %v2007_v1, %v753_v2  ;;  %v2306_v4 = vpop.f32.mrb[9].mxu1 }
 0x21e   :  { %v756_v5 = vpop.f32.mrb[10].mxu1 }
 0x21f   :  { %v760_v6 = vmul.f32 0.01, %v754_v3  ;;  %v757_v7 = vadd.f32 %v2007_v1, %v756_v5  ;;  %v2307_v8 = vpop.f32.mrb[11].mxu1 }
 0x221   :  { %v761_v9 = vmul.f32 0.01, %v757_v7  ;;  %v762_v10 = vmax.f32 %v754_v3, %v760_v6 }
 0x223   :  { %v763_v11 = vmax.f32 %v757_v7, %v761_v9 }
 0x225   :  { %v764_v12 = vpack.c.bf16 %v763_v11, %v762_v10  ;;  %v2608_v10 = vld [vmem:[#allocation4 + $0x168] sm:$0xff]   ;;  %v2609_v11 = vld [vmem:[#allocation4 + $0x170] sm:$0xff]  }
 0x227   :  { %2325 = vmatmul.mubr.bf16.vlgmr.msra.gmra.mrb[8].mxu0 %v764_v12  ;;  %v2610_v12 = vld [vmem:[#allocation4 + $0x178] sm:$0xff]  }
 0x228   :  { %2364 = vmatprep.mubr.msk.bf16.mxu0 %vm2704_vm0, %v2703_v43  ;;  %2349 = vmatpush3.bf16.msra.mxu0 %v2587_v16  ;;  %v2614_v16 = vld [vmem:[#allocation4 + $0x198] sm:$0xff]  }
 0x229   :  { %2350 = vmatprep.subr.bf16.mxu0 %v2703_v43 }
 0x22c   :  { %2351 = vmatpush3.bf16.msra.mxu0 %v2588_v17  ;;  %v2615_v17 = vld [vmem:[#allocation4 + $0x1a0] sm:$0xff]  }
 0x22d   :  { %2352 = vmatprep.subr.bf16.mxu0 %v2703_v43 }
 0x230   :  { %2353 = vmatpush3.bf16.msra.mxu0 %v2589_v18  ;;  %v2047_v18 = vld [vmem:[%s2994_s4 + $0x4] ss:$0 sm:$0xff] }
 0x231   :  { %2354 = vmatprep.subr.bf16.mxu0 %v2703_v43 }
 0x234   :  { %2355 = vmatpush3.bf16.msra.mxu0 %v2590_v19 }
 0x235   :  { %2356 = vmatprep.subr.bf16.mxu0 %v2703_v43 }
 0x238   :  { %2357 = vmatpush3.bf16.msra.mxu0 %v2591_v20 }
 0x239   :  { %2358 = vmatprep.subr.bf16.mxu0 %v2703_v43 }
 0x23c   :  { %2359 = vmatpush3.bf16.msra.mxu0 %v2592_v33  ;;  %v2619_v33 = vld [vmem:[#allocation4 + $0x1c0] sm:$0xff]  }
 0x23d   :  { %2360 = vmatprep.subr.bf16.mxu0 %v2703_v43 }
 0x240   :  { %2361 = vmatpush3.bf16.msra.mxu0 %v2593_v34  ;;  %v2620_v34 = vld [vmem:[#allocation4 + $0x1c8] sm:$0xff]  }
 0x241   :  { %2362 = vmatprep.subr.bf16.mxu0 %v2703_v43 }
 0x244   :  { %2363 = vmatpush3.bf16.msra.mxu0 %v2594_v35  ;;  %v2621_v35 = vld [vmem:[#allocation4 + $0x1d0] sm:$0xff]  }
 0x245   :  { %2388 = vmatprep.subr.bf16.mxu0 %v2703_v43 }
 0x2fa   :  { %v872_v22 = vpop.f32.mrb[8].mxu0 }
 0x2fb   :  { %v873_v23 = vadd.f32 %v2017_v21, %v872_v22  ;;  %v2326_v24 = vpop.f32.mrb[9].mxu0 }
 0x2fc   :  { %v875_v25 = vpop.f32.mrb[10].mxu0 }
 0x2fd   :  { %v879_v26 = vmul.f32 0.01, %v873_v23  ;;  %v876_v27 = vadd.f32 %v2017_v21, %v875_v25  ;;  %v2327_v28 = vpop.f32.mrb[11].mxu0 }
 0x2ff   :  { %v880_v29 = vmul.f32 0.01, %v876_v27  ;;  %v881_v30 = vmax.f32 %v873_v23, %v879_v26 }
 0x301   :  { %v882_v31 = vmax.f32 %v876_v27, %v880_v29 }
 0x303   :  { %v883_v32 = vpack.c.bf16 %v882_v31, %v881_v30  ;;  %v2616_v30 = vld [vmem:[#allocation4 + $0x1a8] sm:$0xff]   ;;  %v2617_v31 = vld [vmem:[#allocation4 + $0x1b0] sm:$0xff]  }
 0x305   :  { %2345 = vmatmul.mubr.bf16.vlgmr.msra.gmra.mrb[12].mxu1 %v883_v32  ;;  %v2618_v32 = vld [vmem:[#allocation4 + $0x1b8] sm:$0xff]  }
 0x306   :  { %2384 = vmatprep.mubr.msk.bf16.mxu1 %vm2704_vm0, %v2703_v43  ;;  %2369 = vmatpush3.bf16.msra.mxu1 %v2595_v36  ;;  %v2622_v36 = vld [vmem:[#allocation4 + $0x1d8] sm:$0xff]  }
 0x307   :  { %2370 = vmatprep.subr.bf16.mxu1 %v2703_v43 }
 0x30a   :  { %2371 = vmatpush3.bf16.msra.mxu1 %v2596_v37  ;;  %v2623_v37 = vld [vmem:[#allocation4 + $0x1e0] sm:$0xff]  }
 0x30b   :  { %2372 = vmatprep.subr.bf16.mxu1 %v2703_v43 }
 0x30e   :  { %2373 = vmatpush3.bf16.msra.mxu1 %v2597_v38  ;;  %v2057_v38 = vld [vmem:[%s2994_s4 + $0x5] ss:$0 sm:$0xff] }
 0x30f   :  { %2374 = vmatprep.subr.bf16.mxu1 %v2703_v43 }
 0x312   :  { %2375 = vmatpush3.bf16.msra.mxu1 %v2598_v39 }
 0x313   :  { %2376 = vmatprep.subr.bf16.mxu1 %v2703_v43 }
 0x316   :  { %2377 = vmatpush3.bf16.msra.mxu1 %v2599_v40 }
 0x317   :  { %2378 = vmatprep.subr.bf16.mxu1 %v2703_v43 }
 0x31a   :  { %2379 = vmatpush3.bf16.msra.mxu1 %v2600_v54  ;;  %v2627_v54 = vld [vmem:[#allocation4 + $0x200] sm:$0xff]  }
 0x31b   :  { %2380 = vmatprep.subr.bf16.mxu1 %v2703_v43 }
 0x31e   :  { %2381 = vmatpush3.bf16.msra.mxu1 %v2601_v55  ;;  %v2628_v55 = vld [vmem:[#allocation4 + $0x208] sm:$0xff]  }
 0x31f   :  { %2382 = vmatprep.subr.bf16.mxu1 %v2703_v43 }
 0x322   :  { %2383 = vmatpush3.bf16.msra.mxu1 %v2602_v56  ;;  %v2629_v56 = vld [vmem:[#allocation4 + $0x210] sm:$0xff]  }
 0x323   :  { %2408 = vmatprep.subr.bf16.mxu1 %v2703_v43 }
 0x3d8   :  { %v991_v42 = vpop.f32.mrb[12].mxu1 }
 0x3d9   :  { %v992_v44 = vadd.f32 %v2027_v41, %v991_v42  ;;  %v2346_v45 = vpop.f32.mrb[13].mxu1 }
 0x3da   :  { %v994_v46 = vpop.f32.mrb[14].mxu1 }
 0x3db   :  { %v998_v47 = vmul.f32 0.01, %v992_v44  ;;  %v995_v48 = vadd.f32 %v2027_v41, %v994_v46  ;;  %v2347_v49 = vpop.f32.mrb[15].mxu1 }
 0x3dd   :  { %v999_v50 = vmul.f32 0.01, %v995_v48  ;;  %v1000_v51 = vmax.f32 %v992_v44, %v998_v47 }
 0x3df   :  { %v1001_v52 = vmax.f32 %v995_v48, %v999_v50 }
 0x3e1   :  { %v1002_v53 = vpack.c.bf16 %v1001_v52, %v1000_v51  ;;  %v2624_v51 = vld [vmem:[#allocation4 + $0x1e8] sm:$0xff]   ;;  %v2625_v52 = vld [vmem:[#allocation4 + $0x1f0] sm:$0xff]  }
 0x3e3   :  { %2365 = vmatmul.mubr.bf16.vlgmr.msra.gmra.mrb[12].mxu0 %v1002_v53  ;;  %v2626_v53 = vld [vmem:[#allocation4 + $0x1f8] sm:$0xff]  }
 0x3e4   :  { %2404 = vmatprep.mubr.msk.bf16.mxu0 %vm2704_vm0, %v2703_v43  ;;  %2389 = vmatpush3.bf16.msra.mxu0 %v2603_v57  ;;  %v2630_v57 = vld [vmem:[#allocation4 + $0x218] sm:$0xff]  }
 0x3e5   :  { %2390 = vmatprep.subr.bf16.mxu0 %v2703_v43 }
 0x3e8   :  { %2391 = vmatpush3.bf16.msra.mxu0 %v2604_v58  ;;  %v2631_v58 = vld [vmem:[#allocation4 + $0x220] sm:$0xff]  }
 0x3e9   :  { %2392 = vmatprep.subr.bf16.mxu0 %v2703_v43 }
 0x3ec   :  { %2393 = vmatpush3.bf16.msra.mxu0 %v2605_v59  ;;  %v2067_v59 = vld [vmem:[%s2994_s4 + $0x6] ss:$0 sm:$0xff] }
 0x3ed   :  { %2394 = vmatprep.subr.bf16.mxu0 %v2703_v43 }
 0x3f0   :  { %2395 = vmatpush3.bf16.msra.mxu0 %v2606_v60 }
 0x3f1   :  { %2396 = vmatprep.subr.bf16.mxu0 %v2703_v43 }
 0x3f4   :  { %2397 = vmatpush3.bf16.msra.mxu0 %v2607_v61 }
 0x3f5   :  { %2398 = vmatprep.subr.bf16.mxu0 %v2703_v43 }
 0x3f8   :  { %2399 = vmatpush3.bf16.msra.mxu0 %v2608_v10  ;;  %v2635_v10 = vld [vmem:[#allocation4 + $0x240] sm:$0xff]  }
 0x3f9   :  { %2400 = vmatprep.subr.bf16.mxu0 %v2703_v43 }
 0x3fc   :  { %2401 = vmatpush3.bf16.msra.mxu0 %v2609_v11  ;;  %v2636_v11 = vld [vmem:[#allocation4 + $0x248] sm:$0xff]  }
 0x3fd   :  { %2402 = vmatprep.subr.bf16.mxu0 %v2703_v43 }
 0x400   :  { %2403 = vmatpush3.bf16.msra.mxu0 %v2610_v12  ;;  %v2637_v12 = vld [vmem:[#allocation4 + $0x250] sm:$0xff]  }
 0x401   :  { %2428 = vmatprep.subr.bf16.mxu0 %v2703_v43 }
 0x4b6   :  { %v1110_v63 = vpop.f32.mrb[12].mxu0 }
 0x4b7   :  { %v1111_v0 = vadd.f32 %v2037_v62, %v1110_v63  ;;  %v2366_v1 = vpop.f32.mrb[13].mxu0 }
 0x4b8   :  { %v1113_v2 = vpop.f32.mrb[14].mxu0 }
 0x4b9   :  { %v1117_v3 = vmul.f32 0.01, %v1111_v0  ;;  %v1114_v4 = vadd.f32 %v2037_v62, %v1113_v2  ;;  %v2367_v5 = vpop.f32.mrb[15].mxu0 }
 0x4bb   :  { %v1118_v6 = vmul.f32 0.01, %v1114_v4  ;;  %v1119_v7 = vmax.f32 %v1111_v0, %v1117_v3 }
 0x4bd   :  { %v1120_v8 = vmax.f32 %v1114_v4, %v1118_v6 }
 0x4bf   :  { %v1121_v9 = vpack.c.bf16 %v1120_v8, %v1119_v7  ;;  %v2632_v7 = vld [vmem:[#allocation4 + $0x228] sm:$0xff]   ;;  %v2633_v8 = vld [vmem:[#allocation4 + $0x230] sm:$0xff]  }
 0x4c1   :  { %2385 = vmatmul.mubr.bf16.vlgmr.msra.gmra.mrb[16].mxu1 %v1121_v9  ;;  %v2634_v9 = vld [vmem:[#allocation4 + $0x238] sm:$0xff]  }
 0x4c2   :  { %2424 = vmatprep.mubr.msk.bf16.mxu1 %vm2704_vm0, %v2703_v43  ;;  %2409 = vmatpush3.bf16.msra.mxu1 %v2611_v13  ;;  %v2638_v13 = vld [vmem:[#allocation4 + $0x258] sm:$0xff]  }
 0x4c3   :  { %2410 = vmatprep.subr.bf16.mxu1 %v2703_v43 }
 0x4c6   :  { %2411 = vmatpush3.bf16.msra.mxu1 %v2612_v14  ;;  %v2639_v14 = vld [vmem:[#allocation4 + $0x260] sm:$0xff]  }
 0x4c7   :  { %2412 = vmatprep.subr.bf16.mxu1 %v2703_v43 }
 0x4ca   :  { %2413 = vmatpush3.bf16.msra.mxu1 %v2613_v15  ;;  %v2077_v15 = vld [vmem:[%s2994_s4 + $0x7] ss:$0 sm:$0xff] }
 0x4cb   :  { %2414 = vmatprep.subr.bf16.mxu1 %v2703_v43 }
 0x4ce   :  { %2415 = vmatpush3.bf16.msra.mxu1 %v2614_v16 }
 0x4cf   :  { %2416 = vmatprep.subr.bf16.mxu1 %v2703_v43 }
 0x4d2   :  { %2417 = vmatpush3.bf16.msra.mxu1 %v2615_v17 }
 0x4d3   :  { %2418 = vmatprep.subr.bf16.mxu1 %v2703_v43 }
 0x4d6   :  { %2419 = vmatpush3.bf16.msra.mxu1 %v2616_v30  ;;  %v2643_v30 = vld [vmem:[%s2995_s5] sm:$0xff]  }
 0x4d7   :  { %2420 = vmatprep.subr.bf16.mxu1 %v2703_v43 }
 0x4da   :  { %2421 = vmatpush3.bf16.msra.mxu1 %v2617_v31  ;;  %v2644_v31 = vld [vmem:[%s2995_s5 + $0x8] sm:$0xff]  }
 0x4db   :  { %2422 = vmatprep.subr.bf16.mxu1 %v2703_v43 }
 0x4de   :  { %2423 = vmatpush3.bf16.msra.mxu1 %v2618_v32  ;;  %v2645_v32 = vld [vmem:[%s2995_s5 + $0x10] sm:$0xff]  }
 0x4df   :  { %2448 = vmatprep.subr.bf16.mxu1 %v2703_v43 }
 0x594   :  { %v1229_v19 = vpop.f32.mrb[16].mxu1 }
 0x595   :  { %v1230_v20 = vadd.f32 %v2047_v18, %v1229_v19  ;;  %v2386_v21 = vpop.f32.mrb[17].mxu1 }
 0x596   :  { %v1232_v22 = vpop.f32.mrb[18].mxu1 }
 0x597   :  { %v1236_v23 = vmul.f32 0.01, %v1230_v20  ;;  %v1233_v24 = vadd.f32 %v2047_v18, %v1232_v22  ;;  %v2387_v25 = vpop.f32.mrb[19].mxu1 }
 0x599   :  { %v1237_v26 = vmul.f32 0.01, %v1233_v24  ;;  %v1238_v27 = vmax.f32 %v1230_v20, %v1236_v23 }
 0x59b   :  { %v1239_v28 = vmax.f32 %v1233_v24, %v1237_v26 }
 0x59d   :  { %v1240_v29 = vpack.c.bf16 %v1239_v28, %v1238_v27  ;;  %v2640_v27 = vld [vmem:[#allocation4 + $0x268] sm:$0xff]   ;;  %v2641_v28 = vld [vmem:[#allocation4 + $0x270] sm:$0xff]  }
 0x59f   :  { %2405 = vmatmul.mubr.bf16.vlgmr.msra.gmra.mrb[16].mxu0 %v1240_v29  ;;  %v2642_v29 = vld [vmem:[#allocation4 + $0x278] sm:$0xff]  }
 0x5a0   :  { %2444 = vmatprep.mubr.msk.bf16.mxu0 %vm2704_vm0, %v2703_v43  ;;  %2429 = vmatpush3.bf16.msra.mxu0 %v2619_v33  ;;  %v2646_v33 = vld [vmem:[%s2995_s5 + $0x18] sm:$0xff]  }
 0x5a1   :  { %2430 = vmatprep.subr.bf16.mxu0 %v2703_v43 }
 0x5a4   :  { %2431 = vmatpush3.bf16.msra.mxu0 %v2620_v34  ;;  %v2647_v34 = vld [vmem:[%s2995_s5 + $0x20] sm:$0xff]  }
 0x5a5   :  { %2432 = vmatprep.subr.bf16.mxu0 %v2703_v43 }
 0x5a8   :  { %2433 = vmatpush3.bf16.msra.mxu0 %v2621_v35  ;;  %v2087_v35 = vld [vmem:[%s2994_s4 + $0x8] ss:$0 sm:$0xff] }
 0x5a9   :  { %2434 = vmatprep.subr.bf16.mxu0 %v2703_v43 }
 0x5ac   :  { %2435 = vmatpush3.bf16.msra.mxu0 %v2622_v36 }
 0x5ad   :  { %2436 = vmatprep.subr.bf16.mxu0 %v2703_v43 }
 0x5b0   :  { %2437 = vmatpush3.bf16.msra.mxu0 %v2623_v37 }
 0x5b1   :  { %2438 = vmatprep.subr.bf16.mxu0 %v2703_v43 }
 0x5b4   :  { %2439 = vmatpush3.bf16.msra.mxu0 %v2624_v51  ;;  %v2097_v51 = vld [vmem:[%s2994_s4 + $0x9] ss:$0 sm:$0xff] }
 0x5b5   :  { %2440 = vmatprep.subr.bf16.mxu0 %v2703_v43 }
 0x5b8   :  { %2441 = vmatpush3.bf16.msra.mxu0 %v2625_v52 }
 0x5b9   :  { %2442 = vmatprep.subr.bf16.mxu0 %v2703_v43 }
 0x5bc   :  { %2443 = vmatpush3.bf16.msra.mxu0 %v2626_v53 }
 0x5bd   :  { %2468 = vmatprep.subr.bf16.mxu0 %v2703_v43 }
 0x672   :  { %v1348_v39 = vpop.f32.mrb[16].mxu0 }
 0x673   :  { %v1349_v40 = vadd.f32 %v2057_v38, %v1348_v39  ;;  %v2406_v41 = vpop.f32.mrb[17].mxu0 }
 0x674   :  { %v1351_v42 = vpop.f32.mrb[18].mxu0 }
 0x675   :  { %v1355_v44 = vmul.f32 0.01, %v1349_v40  ;;  %v1352_v45 = vadd.f32 %v2057_v38, %v1351_v42  ;;  %v2407_v46 = vpop.f32.mrb[19].mxu0 }
 0x677   :  { %v1356_v47 = vmul.f32 0.01, %v1352_v45  ;;  %v1357_v48 = vmax.f32 %v1349_v40, %v1355_v44 }
 0x679   :  { %v1358_v49 = vmax.f32 %v1352_v45, %v1356_v47 }
 0x67b   :  { %v1359_v50 = vpack.c.bf16 %v1358_v49, %v1357_v48  ;;  %v2648_v48 = vld [vmem:[%s2995_s5 + $0x28] sm:$0xff]   ;;  %v2649_v49 = vld [vmem:[%s2995_s5 + $0x30] sm:$0xff]  }
 0x67d   :  { %2425 = vmatmul.mubr.bf16.vlgmr.msra.gmra.mrb[20].mxu1 %v1359_v50  ;;  %v2650_v50 = vld [vmem:[%s2995_s5 + $0x38] sm:$0xff]  }
 0x67e   :  { %2464 = vmatprep.mubr.msk.bf16.mxu1 %vm2704_vm0, %v2703_v43  ;;  %2449 = vmatpush3.bf16.msra.mxu1 %v2627_v54 }
 0x67f   :  { %2450 = vmatprep.subr.bf16.mxu1 %v2703_v43 }
 0x682   :  { %2451 = vmatpush3.bf16.msra.mxu1 %v2628_v55 }
 0x683   :  { %2452 = vmatprep.subr.bf16.mxu1 %v2703_v43 }
 0x686   :  { %2453 = vmatpush3.bf16.msra.mxu1 %v2629_v56 }
 0x687   :  { %2454 = vmatprep.subr.bf16.mxu1 %v2703_v43 }
 0x68a   :  { %2455 = vmatpush3.bf16.msra.mxu1 %v2630_v57 }
 0x68b   :  { %2456 = vmatprep.subr.bf16.mxu1 %v2703_v43 }
 0x68e   :  { %2457 = vmatpush3.bf16.msra.mxu1 %v2631_v58 }
 0x68f   :  { %2458 = vmatprep.subr.bf16.mxu1 %v2703_v43 }
 0x692   :  { %2459 = vmatpush3.bf16.msra.mxu1 %v2632_v7 }
 0x693   :  { %2460 = vmatprep.subr.bf16.mxu1 %v2703_v43 }
 0x696   :  { %2461 = vmatpush3.bf16.msra.mxu1 %v2633_v8 }
 0x697   :  { %2462 = vmatprep.subr.bf16.mxu1 %v2703_v43 }
 0x69a   :  { %2463 = vmatpush3.bf16.msra.mxu1 %v2634_v9 }
 0x69b   :  { %2488 = vmatprep.subr.bf16.mxu1 %v2703_v43 }
 0x750   :  { %v1467_v60 = vpop.f32.mrb[20].mxu1 }
 0x751   :  { %v1468_v61 = vadd.f32 %v2067_v59, %v1467_v60  ;;  %v2426_v62 = vpop.f32.mrb[21].mxu1 }
 0x752   :  { %v1470_v63 = vpop.f32.mrb[22].mxu1  ;;  %v2106_v62 = vld [vmem:[%s2996_s6] ss:$0 sm:$0xff] }
 0x753   :  { %v1474_v0 = vmul.f32 0.01, %v1468_v61  ;;  %v1471_v1 = vadd.f32 %v2067_v59, %v1470_v63  ;;  %v2427_v2 = vpop.f32.mrb[23].mxu1 }
 0x755   :  { %v1475_v3 = vmul.f32 0.01, %v1471_v1  ;;  %v1476_v4 = vmax.f32 %v1468_v61, %v1474_v0 }
 0x757   :  { %v1477_v5 = vmax.f32 %v1471_v1, %v1475_v3 }
 0x759   :  { %v1478_v6 = vpack.c.bf16 %v1477_v5, %v1476_v4 }
 0x75b   :  { %2445 = vmatmul.mubr.bf16.vlgmr.msra.gmra.mrb[20].mxu0 %v1478_v6 }
 0x75c   :  { %2484 = vmatprep.mubr.msk.bf16.mxu0 %vm2704_vm0, %v2703_v43  ;;  %2469 = vmatpush3.bf16.msra.mxu0 %v2635_v10 }
 0x75d   :  { %2470 = vmatprep.subr.bf16.mxu0 %v2703_v43 }
 0x760   :  { %2471 = vmatpush3.bf16.msra.mxu0 %v2636_v11 }
 0x761   :  { %2472 = vmatprep.subr.bf16.mxu0 %v2703_v43 }
 0x764   :  { %2473 = vmatpush3.bf16.msra.mxu0 %v2637_v12 }
 0x765   :  { %2474 = vmatprep.subr.bf16.mxu0 %v2703_v43 }
 0x768   :  { %2475 = vmatpush3.bf16.msra.mxu0 %v2638_v13 }
 0x769   :  { %2476 = vmatprep.subr.bf16.mxu0 %v2703_v43 }
 0x76c   :  { %2477 = vmatpush3.bf16.msra.mxu0 %v2639_v14 }
 0x76d   :  { %2478 = vmatprep.subr.bf16.mxu0 %v2703_v43 }
 0x770   :  { %2479 = vmatpush3.bf16.msra.mxu0 %v2640_v27 }
 0x771   :  { %2480 = vmatprep.subr.bf16.mxu0 %v2703_v43 }
 0x774   :  { %2481 = vmatpush3.bf16.msra.mxu0 %v2641_v28 }
 0x775   :  { %2482 = vmatprep.subr.bf16.mxu0 %v2703_v43 }
 0x778   :  { %2483 = vmatpush3.bf16.msra.mxu0 %v2642_v29 }
 0x82e   :  { %v1586_v16 = vpop.f32.mrb[20].mxu0 }
 0x82f   :  { %v1587_v17 = vadd.f32 %v2077_v15, %v1586_v16  ;;  %v2446_v18 = vpop.f32.mrb[21].mxu0 }
 0x830   :  { %v1589_v19 = vpop.f32.mrb[22].mxu0 }
 0x831   :  { %v1593_v20 = vmul.f32 0.01, %v1587_v17  ;;  %v1590_v21 = vadd.f32 %v2077_v15, %v1589_v19  ;;  %v2447_v22 = vpop.f32.mrb[23].mxu0 }
 0x833   :  { %v1594_v23 = vmul.f32 0.01, %v1590_v21  ;;  %v1595_v24 = vmax.f32 %v1587_v17, %v1593_v20 }
 0x835   :  { %v1596_v25 = vmax.f32 %v1590_v21, %v1594_v23 }
 0x837   :  { %v1597_v26 = vpack.c.bf16 %v1596_v25, %v1595_v24 }
 0x839   :  { %2465 = vmatmul.mubr.bf16.vlgmr.msra.gmra.mrb[24].mxu1 %v1597_v26 }
 0x83a   :  { %2504 = vmatprep.mubr.msk.bf16.mxu1 %vm2704_vm0, %v2703_v43  ;;  %2489 = vmatpush3.bf16.msra.mxu1 %v2643_v30 }
 0x83b   :  { %2490 = vmatprep.subr.bf16.mxu1 %v2703_v43 }
 0x83e   :  { %2491 = vmatpush3.bf16.msra.mxu1 %v2644_v31 }
 0x83f   :  { %2492 = vmatprep.subr.bf16.mxu1 %v2703_v43 }
 0x842   :  { %2493 = vmatpush3.bf16.msra.mxu1 %v2645_v32 }
 0x843   :  { %2494 = vmatprep.subr.bf16.mxu1 %v2703_v43 }
 0x846   :  { %2495 = vmatpush3.bf16.msra.mxu1 %v2646_v33 }
 0x847   :  { %2496 = vmatprep.subr.bf16.mxu1 %v2703_v43 }
 0x84a   :  { %2497 = vmatpush3.bf16.msra.mxu1 %v2647_v34 }
 0x84b   :  { %2498 = vmatprep.subr.bf16.mxu1 %v2703_v43 }
 0x84e   :  { %2499 = vmatpush3.bf16.msra.mxu1 %v2648_v48 }
 0x84f   :  { %2500 = vmatprep.subr.bf16.mxu1 %v2703_v43 }
 0x852   :  { %2501 = vmatpush3.bf16.msra.mxu1 %v2649_v49 }
 0x853   :  { %2502 = vmatprep.subr.bf16.mxu1 %v2703_v43 }
 0x856   :  { %2503 = vmatpush3.bf16.msra.mxu1 %v2650_v50 }
 0x90c   :  { %v1705_v36 = vpop.f32.mrb[24].mxu1 }
 0x90d   :  { %v1706_v37 = vadd.f32 %v2087_v35, %v1705_v36  ;;  %v2466_v38 = vpop.f32.mrb[25].mxu1 }
 0x90e   :  { %v1708_v39 = vpop.f32.mrb[26].mxu1 }
 0x90f   :  { %v1712_v40 = vmul.f32 0.01, %v1706_v37  ;;  %v1709_v41 = vadd.f32 %v2087_v35, %v1708_v39  ;;  %v2467_v42 = vpop.f32.mrb[27].mxu1 }
 0x911   :  { %v1713_v44 = vmul.f32 0.01, %v1709_v41  ;;  %v1714_v45 = vmax.f32 %v1706_v37, %v1712_v40 }
 0x913   :  { %v1715_v46 = vmax.f32 %v1709_v41, %v1713_v44 }
 0x915   :  { %v1716_v47 = vpack.c.bf16 %v1715_v46, %v1714_v45 }
 0x917   :  { %2485 = vmatmul.mubr.bf16.vlgmr.msra.gmra.mrb[24].mxu0 %v1716_v47 }
 0x9ea   :  { %v1824_v52 = vpop.f32.mrb[24].mxu0 }
 0x9eb   :  { %v1825_v53 = vadd.f32 %v2097_v51, %v1824_v52  ;;  %v2486_v54 = vpop.f32.mrb[25].mxu0 }
 0x9ec   :  { %v1827_v55 = vpop.f32.mrb[26].mxu0 }
 0x9ed   :  { %v1831_v56 = vmul.f32 0.01, %v1825_v53  ;;  %v1828_v57 = vadd.f32 %v2097_v51, %v1827_v55  ;;  %v2487_v58 = vpop.f32.mrb[27].mxu0 }
 0x9ef   :  { %v1832_v59 = vmul.f32 0.01, %v1828_v57  ;;  %v1833_v60 = vmax.f32 %v1825_v53, %v1831_v56 }
 0x9f1   :  { %v1834_v61 = vmax.f32 %v1828_v57, %v1832_v59 }
 0x9f3   :  { %v1835_v43 = vpack.c.bf16 %v1834_v61, %v1833_v60 }
 0x9f5   :  { %2505 = vmatmul.mubr.bf16.vlgmr.msra.gmra.mrb[28].mxu1 %v1835_v43 }
 0xac8   :  { %v1941_v63 = vpop.f32.mrb[28].mxu1 }
 0xac9   :  { %v1942_v0 = vadd.f32 %v2106_v62, %v1941_v63  ;;  %v2506_v1 = vpop.f32.mrb[29].mxu1 }
 0xaca   :  { %v1944_v2 = vpop.f32.mrb[30].mxu1 }
 0xacb   :  { %1948 = vst [vmem:[%s2997_s7] sm:$0xff] %v1942_v0  ;;  %v1945_v3 = vadd.f32 %v2106_v62, %v1944_v2  ;;  %v2507_v4 = vpop.f32.mrb[31].mxu1 }
 0xacd   :  { %1949 = vst [vmem:[%s2997_s7 + $0x8] sm:$0xff] %v1945_v3 }
 0xace   :  { %1954 = vsyncpa [#allocation3], 1 }
 0xacf   :  { %1955 = vsyncpa [#allocation5], 1 }

</bundles_post_ra>
